<compile_context>
chip_gen: v5e
topology: v5e:2x2
jax: 0.10.0
libtpu: 0.0.40
codegen_flags: <defaults>
</compile_context>

<pallas_src>
import jax
import jax.numpy as jnp
from jax.experimental import pallas as pl
from jax.experimental.pallas import tpu as pltpu

# ---------------- problem sizes (small, consistent with the module) ----------
B = 2            # batch
D_MODEL = 32     # args.d_model
D_FF = 64        # args.d_ff
NUM_HEADS = 4    # args.num_heads
D_K = D_MODEL // NUM_HEADS
N_ENT = 16       # number of chest-KG entities
KG_DIM = 400     # JSModel_v1.KG_ENTITY_DIM
KG_DIM_PAD = 512 # zero-padded contraction depth (multiple of 128)
HB = NUM_HEADS * B
LN_EPS = 1e-6


def _layer_norm(x, gamma, beta, eps=LN_EPS):
    mu = jnp.mean(x, axis=-1, keepdims=True)
    var = jnp.mean((x - mu) ** 2, axis=-1, keepdims=True)
    return (x - mu) * jax.lax.rsqrt(var + eps) * gamma + beta


# ----------------------------- Pallas kernel ---------------------------------
def kg_mha_ff_kernel(fc_ref, ent_ref, rel_ref,
                     wc_ref, bc_ref, wr_ref, br_ref,
                     wq_ref, bq_ref, wkv_ref, bkv_ref, wo_ref, bo_ref,
                     ln_g_ref, ln_b_ref,
                     w1_ref, b1_ref, w2_ref, b2_ref,
                     hm_ref, sel_ref,
                     out_ref):
    f32 = jnp.float32
    x = fc_ref[...]                                                   # (B, D)

    # ---------- batch-invariant KG work: computed exactly once ---------------
    # proj_clinic_kg: entity_embedding -> (NE, D)
    feats = jnp.dot(ent_ref[...], wc_ref[...],
                    preferred_element_type=f32) + bc_ref[...]         # (NE, D)
    # proj_relation -> per-entity attention bias, laid out on lanes: (1, NE)
    bias = jax.lax.dot_general(
        wr_ref[...], rel_ref[...], (((0,), (1,)), ((), ())),
        preferred_element_type=f32) + br_ref[0]                       # (1, NE)
    # fused K/V projection of the (batch-invariant) KG features
    kv = jnp.dot(feats, wkv_ref[...],
                 preferred_element_type=f32) + bkv_ref[...]           # (NE, 2D)
    k = kv[:, :D_MODEL]                                               # (NE, D)
    v = kv[:, D_MODEL:]                                               # (NE, D)

    ln_g = ln_g_ref[...]
    ln_b = ln_b_ref[...]

    # ---------- sublayer 0: x + self_attn(norm(x), feats, feats, bias) -------
    xn = _layer_norm(x, ln_g[0:1, :], ln_b[0:1, :])                   # (B, D)
    q = jnp.dot(xn, wq_ref[...], preferred_element_type=f32) + bq_ref[...]

    # All heads at once: rows of the score matmul are (head, batch) pairs,
    # ordered h-major / b-minor (row r -> head r // B, batch r % B).
    head_mask = hm_ref[...]                                           # (HB, D)
    q_big = jnp.concatenate([q] * NUM_HEADS, axis=0)                  # (HB, D)
    qm = q_big * head_mask                                            # keep only own head lanes

    scale = D_K ** -0.5
    s = jax.lax.dot_general(qm, k, (((1,), (1,)), ((), ())),
                            preferred_element_type=f32) * scale + bias    # (HB, NE)

    # single softmax over all (head, batch) rows
    s = s - jnp.max(s, axis=-1, keepdims=True)
    p = jnp.exp(s)
    p = p * pl.reciprocal(jnp.sum(p, axis=-1, keepdims=True), approx=False)

    ctx_rows = jnp.dot(p, v, preferred_element_type=f32) * head_mask      # (HB, D)
    # fold the per-head rows of each batch element back together: (B, D)
    ctx = jnp.dot(sel_ref[...], ctx_rows, preferred_element_type=f32)

    attn_out = jnp.dot(ctx, wo_ref[...], preferred_element_type=f32) + bo_ref[...]
    x1 = x + attn_out                                                 # dropout = identity

    # ---------- sublayer 1: x1 + FF(norm(x1)) --------------------------------
    x1n = _layer_norm(x1, ln_g[1:2, :], ln_b[1:2, :])
    h1 = jnp.maximum(jnp.dot(x1n, w1_ref[...], preferred_element_type=f32)
                     + b1_ref[...], 0.0)
    ff = jnp.dot(h1, w2_ref[...], preferred_element_type=f32) + b2_ref[...]
    out_ref[...] = (x1 + ff).astype(out_ref.dtype)


# ----------------------------- wrapper ---------------------------------------
@jax.jit
def kg_mha_ff(fc_feats, entity_embedding, relation_embedding, params):
    """fc_feats (B, D), entity_embedding (NE, 400), relation_embedding (NE, 400)
    -> clinic_embed (B, 1, D)."""
    pad = KG_DIM_PAD - KG_DIM
    ent_p = jnp.pad(entity_embedding, ((0, 0), (0, pad)))             # (NE, 512)
    rel_p = jnp.pad(relation_embedding, ((0, 0), (0, pad)))           # (NE, 512)
    wc_p = jnp.pad(params["wc"], ((0, pad), (0, 0)))                  # (512, D)
    wr_p = jnp.pad(params["wr"], ((0, pad), (0, 0)))                  # (512, 1)
    wkv = jnp.concatenate([params["wk"], params["wv"]], axis=1)       # (D, 2D)
    bkv = jnp.concatenate([params["bk"], params["bv"]], axis=1)       # (1, 2D)
    br = params["br"].reshape(-1)                                     # (1,) -> SMEM scalar

    # constant head-selection masks (constant-folded by XLA, tiny VMEM inputs)
    col_head = jnp.arange(D_MODEL) // D_K                             # (D,)
    row_head = jnp.repeat(jnp.arange(NUM_HEADS), B)                   # (HB,) r -> r // B
    head_mask = (row_head[:, None] == col_head[None, :]).astype(jnp.float32)  # (HB, D)
    row_batch = jnp.tile(jnp.arange(B), NUM_HEADS)                    # (HB,) r -> r % B
    sel = (jnp.arange(B)[:, None] == row_batch[None, :]).astype(jnp.float32)   # (B, HB)

    vmem = pl.BlockSpec(memory_space=pltpu.MemorySpace.VMEM)
    smem = pl.BlockSpec(memory_space=pltpu.MemorySpace.SMEM)

    out = pl.pallas_call(
        kg_mha_ff_kernel,
        out_shape=jax.ShapeDtypeStruct((B, D_MODEL), jnp.float32),
        in_specs=[vmem, vmem, vmem, vmem, vmem, vmem, smem] + [vmem] * 14,
        out_specs=vmem,
    )(fc_feats, ent_p, rel_p, wc_p, params["bc"], wr_p, br,
      params["wq"], params["bq"], wkv, bkv, params["wo"], params["bo"],
      params["ln_g"], params["ln_b"],
      params["w1"], params["b1"], params["w2"], params["b2"],
      head_mask, sel)
    return out[:, None, :]   # (B, 1, D) == clinic_embed


# ----------------------------- pure-JAX reference -----------------------------
def reference(fc_feats, ent, rel, p):
    feats = ent @ p["wc"] + p["bc"]                      # (NE, D)
    bias = (rel @ p["wr"] + p["br"])[:, 0]               # (NE,)  (== .squeeze())
    x = fc_feats[:, None, :]                             # (B, 1, D)
    xn = _layer_norm(x, p["ln_g"][0], p["ln_b"][0])
    q = xn @ p["wq"] + p["bq"]
    k = feats @ p["wk"] + p["bk"]
    v = feats @ p["wv"] + p["bv"]
    qh = q.reshape(B, 1, NUM_HEADS, D_K).transpose(0, 2, 1, 3)   # (B,H,1,Dk)
    kh = k.reshape(N_ENT, NUM_HEADS, D_K).transpose(1, 0, 2)     # (H,NE,Dk)
    vh = v.reshape(N_ENT, NUM_HEADS, D_K).transpose(1, 0, 2)
    s = jnp.einsum("bhqd,hnd->bhqn", qh, kh) / jnp.sqrt(jnp.float32(D_K)) + bias
    pa = jax.nn.softmax(s, axis=-1)
    ctx = jnp.einsum("bhqn,hnd->bhqd", pa, vh)
    ctx = ctx.transpose(0, 2, 1, 3).reshape(B, 1, D_MODEL)
    x1 = x + (ctx @ p["wo"] + p["bo"])
    x1n = _layer_norm(x1, p["ln_g"][1], p["ln_b"][1])
    ff = jnp.maximum(x1n @ p["w1"] + p["b1"], 0.0) @ p["w2"] + p["b2"]
    return x1 + ff


# ----------------------------- main -------------------------------------------
if __name__ == "__main__":
    key = jax.random.PRNGKey(0)
    keys = jax.random.split(key, 16)

    def kaiming(k, shape):
        fan_in = shape[0]
        return jax.random.normal(k, shape, jnp.float32) * jnp.sqrt(2.0 / fan_in)

    # Inputs (fc_feats stands in for proj_v1(VisualExtractor(images)) output).
    fc_feats = jax.random.normal(keys[0], (B, D_MODEL), jnp.float32)
    entity_embedding = jax.random.normal(keys[1], (N_ENT, KG_DIM), jnp.float32)
    relation_embedding = jax.random.normal(keys[2], (N_ENT, KG_DIM), jnp.float32)

    params = {
        # proj_clinic_kg (kaiming init, zero bias -> init_weight)
        "wc": kaiming(keys[3], (KG_DIM, D_MODEL)),
        "bc": jnp.zeros((1, D_MODEL), jnp.float32),
        # proj_relation (kaiming init, zero bias)
        "wr": kaiming(keys[4], (KG_DIM, 1)),
        "br": jnp.zeros((1, 1), jnp.float32),
        # KGMultiHeadAttention: 4 x Linear(d_model, d_model)
        "wq": kaiming(keys[5], (D_MODEL, D_MODEL)),
        "wk": kaiming(keys[6], (D_MODEL, D_MODEL)),
        "wv": kaiming(keys[7], (D_MODEL, D_MODEL)),
        "wo": kaiming(keys[8], (D_MODEL, D_MODEL)),
        "bq": jnp.zeros((1, D_MODEL), jnp.float32),
        "bk": jnp.zeros((1, D_MODEL), jnp.float32),
        "bv": jnp.zeros((1, D_MODEL), jnp.float32),
        "bo": jnp.zeros((1, D_MODEL), jnp.float32),
        # SublayerConnection LayerNorms
        "ln_g": jnp.ones((2, D_MODEL), jnp.float32),
        "ln_b": jnp.zeros((2, D_MODEL), jnp.float32),
        # PositionwiseFeedForward
        "w1": kaiming(keys[9], (D_MODEL, D_FF)),
        "b1": jnp.zeros((1, D_FF), jnp.float32),
        "w2": kaiming(keys[10], (D_FF, D_MODEL)),
        "b2": jnp.zeros((1, D_MODEL), jnp.float32),
    }

    clinic_embed = kg_mha_ff(fc_feats, entity_embedding, relation_embedding, params)
    clinic_embed = jax.block_until_ready(clinic_embed)

    ref = reference(fc_feats, entity_embedding, relation_embedding, params)
    assert clinic_embed.shape == (B, 1, D_MODEL)
    assert jnp.all(jnp.isfinite(clinic_embed))
    assert jnp.allclose(clinic_embed, ref, rtol=1e-4, atol=1e-4), (
        float(jnp.max(jnp.abs(clinic_embed - ref))))

    print("KERNEL_OK")
</pallas_src>

<mosaic_0001>
module attributes {stable_mosaic.version = 11 : i64} {
  func.func @kg_mha_ff_kernel(%arg0: memref<2x32xf32, #tpu.memory_space<vmem>>, %arg1: memref<16x512xf32, #tpu.memory_space<vmem>>, %arg2: memref<16x512xf32, #tpu.memory_space<vmem>>, %arg3: memref<512x32xf32, #tpu.memory_space<vmem>>, %arg4: memref<1x32xf32, #tpu.memory_space<vmem>>, %arg5: memref<512x1xf32, #tpu.memory_space<vmem>>, %arg6: memref<1xf32, #tpu.memory_space<smem>>, %arg7: memref<32x32xf32, #tpu.memory_space<vmem>>, %arg8: memref<1x32xf32, #tpu.memory_space<vmem>>, %arg9: memref<32x64xf32, #tpu.memory_space<vmem>>, %arg10: memref<1x64xf32, #tpu.memory_space<vmem>>, %arg11: memref<32x32xf32, #tpu.memory_space<vmem>>, %arg12: memref<1x32xf32, #tpu.memory_space<vmem>>, %arg13: memref<2x32xf32, #tpu.memory_space<vmem>>, %arg14: memref<2x32xf32, #tpu.memory_space<vmem>>, %arg15: memref<32x64xf32, #tpu.memory_space<vmem>>, %arg16: memref<1x64xf32, #tpu.memory_space<vmem>>, %arg17: memref<64x32xf32, #tpu.memory_space<vmem>>, %arg18: memref<1x32xf32, #tpu.memory_space<vmem>>, %arg19: memref<8x32xf32, #tpu.memory_space<vmem>>, %arg20: memref<2x8xf32, #tpu.memory_space<vmem>>, %arg21: memref<2x32xf32, #tpu.memory_space<vmem>>) attributes {dimension_semantics = [], scalar_prefetch = 0 : i64, scratch_operands = 0 : i64, tpu.core_type = #tpu.core_type<tc>} {
    %c0 = arith.constant 0 : index
    %c0_0 = arith.constant 0 : index
    %0 = vector.load %arg0[%c0, %c0_0] : memref<2x32xf32, #tpu.memory_space<vmem>>, vector<2x32xf32>
    %c0_1 = arith.constant 0 : index
    %c0_2 = arith.constant 0 : index
    %1 = vector.load %arg1[%c0_1, %c0_2] : memref<16x512xf32, #tpu.memory_space<vmem>>, vector<16x512xf32>
    %c0_3 = arith.constant 0 : index
    %c0_4 = arith.constant 0 : index
    %2 = vector.load %arg3[%c0_3, %c0_4] : memref<512x32xf32, #tpu.memory_space<vmem>>, vector<512x32xf32>
    %cst = arith.constant dense<0.000000e+00> : vector<16x32xf32>
    %3 = tpu.matmul %1, %2, %cst {dimension_numbers = #tpu.dot_dimension_numbers<[1], [0], [0], [1], [0, 0, 1, 1], [], []>} : vector<16x512xf32>, vector<512x32xf32>, vector<16x32xf32> -> vector<16x32xf32>
    %c0_5 = arith.constant 0 : index
    %c0_6 = arith.constant 0 : index
    %4 = vector.load %arg4[%c0_5, %c0_6] : memref<1x32xf32, #tpu.memory_space<vmem>>, vector<1x32xf32>
    %5 = vector.broadcast %4 : vector<1x32xf32> to vector<16x32xf32>
    %6 = arith.addf %3, %5 : vector<16x32xf32>
    %c0_7 = arith.constant 0 : index
    %c0_8 = arith.constant 0 : index
    %7 = vector.load %arg5[%c0_7, %c0_8] : memref<512x1xf32, #tpu.memory_space<vmem>>, vector<512x1xf32>
    %c0_9 = arith.constant 0 : index
    %c0_10 = arith.constant 0 : index
    %8 = vector.load %arg2[%c0_9, %c0_10] : memref<16x512xf32, #tpu.memory_space<vmem>>, vector<16x512xf32>
    %cst_11 = arith.constant dense<0.000000e+00> : vector<1x16xf32>
    %9 = tpu.matmul %7, %8, %cst_11 {dimension_numbers = #tpu.dot_dimension_numbers<[0], [1], [1], [0], [0, 1, 1, 0], [], []>} : vector<512x1xf32>, vector<16x512xf32>, vector<1x16xf32> -> vector<1x16xf32>
    %c0_12 = arith.constant 0 : index
    %10 = memref.load %arg6[%c0_12] : memref<1xf32, #tpu.memory_space<smem>>
    %11 = vector.broadcast %10 : f32 to vector<1x16xf32>
    %12 = arith.addf %9, %11 : vector<1x16xf32>
    %c0_13 = arith.constant 0 : index
    %c0_14 = arith.constant 0 : index
    %13 = vector.load %arg9[%c0_13, %c0_14] : memref<32x64xf32, #tpu.memory_space<vmem>>, vector<32x64xf32>
    %cst_15 = arith.constant dense<0.000000e+00> : vector<16x64xf32>
    %14 = tpu.matmul %6, %13, %cst_15 {dimension_numbers = #tpu.dot_dimension_numbers<[1], [0], [0], [1], [0, 0, 1, 1], [], []>} : vector<16x32xf32>, vector<32x64xf32>, vector<16x64xf32> -> vector<16x64xf32>
    %c0_16 = arith.constant 0 : index
    %c0_17 = arith.constant 0 : index
    %15 = vector.load %arg10[%c0_16, %c0_17] : memref<1x64xf32, #tpu.memory_space<vmem>>, vector<1x64xf32>
    %16 = vector.broadcast %15 : vector<1x64xf32> to vector<16x64xf32>
    %17 = arith.addf %14, %16 : vector<16x64xf32>
    %18 = vector.extract_strided_slice %17 {offsets = [0, 0], sizes = [16, 32], strides = [1, 1]} : vector<16x64xf32> to vector<16x32xf32>
    %19 = vector.extract_strided_slice %17 {offsets = [0, 32], sizes = [16, 32], strides = [1, 1]} : vector<16x64xf32> to vector<16x32xf32>
    %c0_18 = arith.constant 0 : index
    %c0_19 = arith.constant 0 : index
    %20 = vector.load %arg13[%c0_18, %c0_19] : memref<2x32xf32, #tpu.memory_space<vmem>>, vector<2x32xf32>
    %c0_20 = arith.constant 0 : index
    %c0_21 = arith.constant 0 : index
    %21 = vector.load %arg14[%c0_20, %c0_21] : memref<2x32xf32, #tpu.memory_space<vmem>>, vector<2x32xf32>
    %22 = vector.extract_strided_slice %20 {offsets = [0, 0], sizes = [1, 32], strides = [1, 1]} : vector<2x32xf32> to vector<1x32xf32>
    %23 = vector.extract_strided_slice %21 {offsets = [0, 0], sizes = [1, 32], strides = [1, 1]} : vector<2x32xf32> to vector<1x32xf32>
    %cst_22 = arith.constant dense<0.000000e+00> : vector<2xf32>
    %24 = vector.multi_reduction <add>, %0, %cst_22 [1] : vector<2x32xf32> to vector<2xf32>
    %25 = vector.shape_cast %24 : vector<2xf32> to vector<2x1xf32>
    %cst_23 = arith.constant 3.200000e+01 : f32
    %26 = vector.broadcast %cst_23 : f32 to vector<2x1xf32>
    %27 = arith.divf %25, %26 : vector<2x1xf32>
    %28 = vector.broadcast %27 : vector<2x1xf32> to vector<2x32xf32>
    %29 = arith.subf %0, %28 : vector<2x32xf32>
    %30 = arith.mulf %29, %29 : vector<2x32xf32>
    %cst_24 = arith.constant dense<0.000000e+00> : vector<2xf32>
    %31 = vector.multi_reduction <add>, %30, %cst_24 [1] : vector<2x32xf32> to vector<2xf32>
    %32 = vector.shape_cast %31 : vector<2xf32> to vector<2x1xf32>
    %cst_25 = arith.constant 3.200000e+01 : f32
    %33 = vector.broadcast %cst_25 : f32 to vector<2x1xf32>
    %34 = arith.divf %32, %33 : vector<2x1xf32>
    %35 = vector.broadcast %27 : vector<2x1xf32> to vector<2x32xf32>
    %36 = arith.subf %0, %35 : vector<2x32xf32>
    %cst_26 = arith.constant 9.99999997E-7 : f32
    %37 = vector.broadcast %cst_26 : f32 to vector<2x1xf32>
    %38 = arith.addf %34, %37 : vector<2x1xf32>
    %39 = math.rsqrt %38 : vector<2x1xf32>
    %40 = vector.broadcast %39 : vector<2x1xf32> to vector<2x32xf32>
    %41 = arith.mulf %36, %40 : vector<2x32xf32>
    %42 = vector.broadcast %22 : vector<1x32xf32> to vector<2x32xf32>
    %43 = arith.mulf %41, %42 : vector<2x32xf32>
    %44 = vector.broadcast %23 : vector<1x32xf32> to vector<2x32xf32>
    %45 = arith.addf %43, %44 : vector<2x32xf32>
    %c0_27 = arith.constant 0 : index
    %c0_28 = arith.constant 0 : index
    %46 = vector.load %arg7[%c0_27, %c0_28] : memref<32x32xf32, #tpu.memory_space<vmem>>, vector<32x32xf32>
    %cst_29 = arith.constant dense<0.000000e+00> : vector<2x32xf32>
    %47 = tpu.matmul %45, %46, %cst_29 {dimension_numbers = #tpu.dot_dimension_numbers<[1], [0], [0], [1], [0, 0, 1, 1], [], []>} : vector<2x32xf32>, vector<32x32xf32>, vector<2x32xf32> -> vector<2x32xf32>
    %c0_30 = arith.constant 0 : index
    %c0_31 = arith.constant 0 : index
    %48 = vector.load %arg8[%c0_30, %c0_31] : memref<1x32xf32, #tpu.memory_space<vmem>>, vector<1x32xf32>
    %49 = vector.broadcast %48 : vector<1x32xf32> to vector<2x32xf32>
    %50 = arith.addf %47, %49 : vector<2x32xf32>
    %c0_32 = arith.constant 0 : index
    %c0_33 = arith.constant 0 : index
    %51 = vector.load %arg19[%c0_32, %c0_33] : memref<8x32xf32, #tpu.memory_space<vmem>>, vector<8x32xf32>
    %52 = tpu.concatenate %50, %50, %50, %50 in 0 : vector<2x32xf32>, vector<2x32xf32>, vector<2x32xf32>, vector<2x32xf32> -> vector<8x32xf32>
    %53 = arith.mulf %52, %51 : vector<8x32xf32>
    %cst_34 = arith.constant dense<0.000000e+00> : vector<8x16xf32>
    %54 = tpu.matmul %53, %18, %cst_34 {dimension_numbers = #tpu.dot_dimension_numbers<[1], [1], [0], [0], [0, 0, 1, 0], [], []>} : vector<8x32xf32>, vector<16x32xf32>, vector<8x16xf32> -> vector<8x16xf32>
    %cst_35 = arith.constant 0.353553385 : f32
    %55 = vector.broadcast %cst_35 : f32 to vector<8x16xf32>
    %56 = arith.mulf %54, %55 : vector<8x16xf32>
    %57 = vector.broadcast %12 : vector<1x16xf32> to vector<8x16xf32>
    %58 = arith.addf %56, %57 : vector<8x16xf32>
    %cst_36 = arith.constant dense<0xFF800000> : vector<8xf32>
    %59 = vector.multi_reduction <maximumf>, %58, %cst_36 [1] : vector<8x16xf32> to vector<8xf32>
    %60 = vector.shape_cast %59 : vector<8xf32> to vector<8x1xf32>
    %61 = vector.broadcast %60 : vector<8x1xf32> to vector<8x16xf32>
    %62 = arith.subf %58, %61 : vector<8x16xf32>
    %63 = math.exp %62 : vector<8x16xf32>
    %cst_37 = arith.constant dense<0.000000e+00> : vector<8xf32>
    %64 = vector.multi_reduction <add>, %63, %cst_37 [1] : vector<8x16xf32> to vector<8xf32>
    %65 = vector.shape_cast %64 : vector<8xf32> to vector<8x1xf32>
    %66 = tpu.reciprocal %65 : vector<8x1xf32> -> vector<8x1xf32>
    %67 = vector.broadcast %66 : vector<8x1xf32> to vector<8x16xf32>
    %68 = arith.mulf %63, %67 : vector<8x16xf32>
    %cst_38 = arith.constant dense<0.000000e+00> : vector<8x32xf32>
    %69 = tpu.matmul %68, %19, %cst_38 {dimension_numbers = #tpu.dot_dimension_numbers<[1], [0], [0], [1], [0, 0, 1, 1], [], []>} : vector<8x16xf32>, vector<16x32xf32>, vector<8x32xf32> -> vector<8x32xf32>
    %70 = arith.mulf %69, %51 : vector<8x32xf32>
    %c0_39 = arith.constant 0 : index
    %c0_40 = arith.constant 0 : index
    %71 = vector.load %arg20[%c0_39, %c0_40] : memref<2x8xf32, #tpu.memory_space<vmem>>, vector<2x8xf32>
    %cst_41 = arith.constant dense<0.000000e+00> : vector<2x32xf32>
    %72 = tpu.matmul %71, %70, %cst_41 {dimension_numbers = #tpu.dot_dimension_numbers<[1], [0], [0], [1], [0, 0, 1, 1], [], []>} : vector<2x8xf32>, vector<8x32xf32>, vector<2x32xf32> -> vector<2x32xf32>
    %c0_42 = arith.constant 0 : index
    %c0_43 = arith.constant 0 : index
    %73 = vector.load %arg11[%c0_42, %c0_43] : memref<32x32xf32, #tpu.memory_space<vmem>>, vector<32x32xf32>
    %cst_44 = arith.constant dense<0.000000e+00> : vector<2x32xf32>
    %74 = tpu.matmul %72, %73, %cst_44 {dimension_numbers = #tpu.dot_dimension_numbers<[1], [0], [0], [1], [0, 0, 1, 1], [], []>} : vector<2x32xf32>, vector<32x32xf32>, vector<2x32xf32> -> vector<2x32xf32>
    %c0_45 = arith.constant 0 : index
    %c0_46 = arith.constant 0 : index
    %75 = vector.load %arg12[%c0_45, %c0_46] : memref<1x32xf32, #tpu.memory_space<vmem>>, vector<1x32xf32>
    %76 = vector.broadcast %75 : vector<1x32xf32> to vector<2x32xf32>
    %77 = arith.addf %74, %76 : vector<2x32xf32>
    %78 = arith.addf %0, %77 : vector<2x32xf32>
    %79 = vector.extract_strided_slice %20 {offsets = [1, 0], sizes = [1, 32], strides = [1, 1]} : vector<2x32xf32> to vector<1x32xf32>
    %80 = vector.extract_strided_slice %21 {offsets = [1, 0], sizes = [1, 32], strides = [1, 1]} : vector<2x32xf32> to vector<1x32xf32>
    %cst_47 = arith.constant dense<0.000000e+00> : vector<2xf32>
    %81 = vector.multi_reduction <add>, %78, %cst_47 [1] : vector<2x32xf32> to vector<2xf32>
    %82 = vector.shape_cast %81 : vector<2xf32> to vector<2x1xf32>
    %cst_48 = arith.constant 3.200000e+01 : f32
    %83 = vector.broadcast %cst_48 : f32 to vector<2x1xf32>
    %84 = arith.divf %82, %83 : vector<2x1xf32>
    %85 = vector.broadcast %84 : vector<2x1xf32> to vector<2x32xf32>
    %86 = arith.subf %78, %85 : vector<2x32xf32>
    %87 = arith.mulf %86, %86 : vector<2x32xf32>
    %cst_49 = arith.constant dense<0.000000e+00> : vector<2xf32>
    %88 = vector.multi_reduction <add>, %87, %cst_49 [1] : vector<2x32xf32> to vector<2xf32>
    %89 = vector.shape_cast %88 : vector<2xf32> to vector<2x1xf32>
    %cst_50 = arith.constant 3.200000e+01 : f32
    %90 = vector.broadcast %cst_50 : f32 to vector<2x1xf32>
    %91 = arith.divf %89, %90 : vector<2x1xf32>
    %92 = vector.broadcast %84 : vector<2x1xf32> to vector<2x32xf32>
    %93 = arith.subf %78, %92 : vector<2x32xf32>
    %cst_51 = arith.constant 9.99999997E-7 : f32
    %94 = vector.broadcast %cst_51 : f32 to vector<2x1xf32>
    %95 = arith.addf %91, %94 : vector<2x1xf32>
    %96 = math.rsqrt %95 : vector<2x1xf32>
    %97 = vector.broadcast %96 : vector<2x1xf32> to vector<2x32xf32>
    %98 = arith.mulf %93, %97 : vector<2x32xf32>
    %99 = vector.broadcast %79 : vector<1x32xf32> to vector<2x32xf32>
    %100 = arith.mulf %98, %99 : vector<2x32xf32>
    %101 = vector.broadcast %80 : vector<1x32xf32> to vector<2x32xf32>
    %102 = arith.addf %100, %101 : vector<2x32xf32>
    %c0_52 = arith.constant 0 : index
    %c0_53 = arith.constant 0 : index
    %103 = vector.load %arg15[%c0_52, %c0_53] : memref<32x64xf32, #tpu.memory_space<vmem>>, vector<32x64xf32>
    %cst_54 = arith.constant dense<0.000000e+00> : vector<2x64xf32>
    %104 = tpu.matmul %102, %103, %cst_54 {dimension_numbers = #tpu.dot_dimension_numbers<[1], [0], [0], [1], [0, 0, 1, 1], [], []>} : vector<2x32xf32>, vector<32x64xf32>, vector<2x64xf32> -> vector<2x64xf32>
    %c0_55 = arith.constant 0 : index
    %c0_56 = arith.constant 0 : index
    %105 = vector.load %arg16[%c0_55, %c0_56] : memref<1x64xf32, #tpu.memory_space<vmem>>, vector<1x64xf32>
    %106 = vector.broadcast %105 : vector<1x64xf32> to vector<2x64xf32>
    %107 = arith.addf %104, %106 : vector<2x64xf32>
    %cst_57 = arith.constant 0.000000e+00 : f32
    %108 = vector.broadcast %cst_57 : f32 to vector<2x64xf32>
    %109 = arith.maximumf %107, %108 : vector<2x64xf32>
    %c0_58 = arith.constant 0 : index
    %c0_59 = arith.constant 0 : index
    %110 = vector.load %arg17[%c0_58, %c0_59] : memref<64x32xf32, #tpu.memory_space<vmem>>, vector<64x32xf32>
    %cst_60 = arith.constant dense<0.000000e+00> : vector<2x32xf32>
    %111 = tpu.matmul %109, %110, %cst_60 {dimension_numbers = #tpu.dot_dimension_numbers<[1], [0], [0], [1], [0, 0, 1, 1], [], []>} : vector<2x64xf32>, vector<64x32xf32>, vector<2x32xf32> -> vector<2x32xf32>
    %c0_61 = arith.constant 0 : index
    %c0_62 = arith.constant 0 : index
    %112 = vector.load %arg18[%c0_61, %c0_62] : memref<1x32xf32, #tpu.memory_space<vmem>>, vector<1x32xf32>
    %113 = vector.broadcast %112 : vector<1x32xf32> to vector<2x32xf32>
    %114 = arith.addf %111, %113 : vector<2x32xf32>
    %115 = arith.addf %78, %114 : vector<2x32xf32>
    %c0_63 = arith.constant 0 : index
    %c0_64 = arith.constant 0 : index
    %116 = vector.load %arg21[%c0_63, %c0_64] : memref<2x32xf32, #tpu.memory_space<vmem>>, vector<2x32xf32>
    tpu.vector_store %arg21[%c0_63, %c0_64], %115 {strides = array<i32>} : memref<2x32xf32, #tpu.memory_space<vmem>>, vector<2x32xf32>,
    return
  }
}

</mosaic_0001>

<bundles_post_ra>
// kernel: eq.15
= control target key start
LH: loop header
LB: loop body
LE: loop exit
PB: predicated region body
PF: predicated region fallthrough
CT: control target
= control target key end

     0   :  { %s37_s8 = smov 2   ;;  %s38_s9 = smov 4   ;;  %vm7_vm0 = vcmask 15360   ;;  %vm13_vm1 = vcmask 64560   ;;  %vm19_vm2 = vcmask 48160   ;;  %vm25_vm3 = vcmask 31760   ;;  %s55_s0 = inlined_call_operand.vmem [shape: s32[4,2], index: 0, kind: input, shape index: {}]   ;;  %s56_s1 = inlined_call_operand.vmem [shape: s32[8], index: 1, kind: output, shape index: {}]  }
   0x1   :  { %v4_v0 = vld [vmem:[%s55_s0] sm:$0xf]  ;;  %s36_s0 = smov 6  }
   0x2   :  { %5 = vst [vmem:[#allocation1] sm:$0xf] %v4_v0 }
   0x9   :  { %v10_v1 = vld [vmem:[#allocation1 + $0x3] sm:$0x1]   ;;  %v22_v2 = vld [vmem:[#allocation1 + $0x1] sm:$0x1]   ;;  %v16_v3 = vld [vmem:[#allocation1 + $0x2] sm:$0x1]  }
   0xa   :  { %11 = vrot.lane.b32.xlu0 %v10_v1, %s36_s0  ;;  %23 = vrot.lane.b32.xlu1 %v22_v2, %s37_s8  ;;  %v6_v4 = vld [vmem:[#allocation1] sm:$0x1]  }
   0xb   :  { %8 = vst.msk [vmem:[#allocation0] sm:$0x1] %vm7_vm0, %v6_v4  }
  0x12   :  { %17 = vrot.lane.b32.xlu0 %v16_v3, %s38_s9 }
  0x7c   :  { %v12_v5 = vpop.permute.xlu0 %11   ;;  %v24_v6 = vpop.permute.xlu1 %23  }
  0x7d   :  { %14 = vst.msk [vmem:[#allocation0] sm:$0x1] %vm13_vm1, %v12_v5  }
  0x84   :  { %v18_v7 = vpop.permute.xlu0 %17  }
  0x85   :  { %20 = vst.msk [vmem:[#allocation0] sm:$0x1] %vm19_vm2, %v18_v7  }
  0x86   :  { %26 = vst.msk [vmem:[#allocation0] sm:$0x1] %vm25_vm3, %v24_v6  }
  0x8d   :  { %v29_v8 = vld [vmem:[#allocation0] sm:$0x1] }
  0x8e   :  { %32 = vst [vmem:[%s56_s1] sm:$0x1] %v29_v8 }

// kernel: kg_mha_ff.1
= control target key start
LH: loop header
LB: loop body
LE: loop exit
PB: predicated region body
PF: predicated region fallthrough
CT: control target
= control target key end

     0   :  { %s1745_s0 = inlined_call_operand.vmem [shape: f32[2,32], index: 0, kind: input, shape index: {}]   ;;  %s1746_s1 = inlined_call_operand.vmem [shape: f32[16,512], index: 1, kind: input, shape index: {}]   ;;  %s1747_s2 = inlined_call_operand.vmem [shape: f32[16,512], index: 2, kind: input, shape index: {}]   ;;  %s1748_s3 = inlined_call_operand.vmem [shape: f32[512,32], index: 3, kind: input, shape index: {}]   ;;  %s1749_s4 = inlined_call_operand.vmem [shape: f32[1,32], index: 4, kind: input, shape index: {}]   ;;  %s1750_s5 = inlined_call_operand.vmem [shape: f32[512,1], index: 5, kind: input, shape index: {}]   ;;  %s1751_s6 = inlined_call_operand.<no memory space> [shape: f32[1], index: 6, kind: input, shape index: {}]   ;;  %s1752_s7 = inlined_call_operand.vmem [shape: f32[32,32], index: 7, kind: input, shape index: {}]   ;;  %s1753_s8 = inlined_call_operand.vmem [shape: f32[1,32], index: 8, kind: input, shape index: {}]   ;;  %s1754_s9 = inlined_call_operand.vmem [shape: f32[32,64], index: 9, kind: input, shape index: {}]   ;;  %s1755_s10 = inlined_call_operand.vmem [shape: f32[1,64], index: 10, kind: input, shape index: {}]   ;;  %s1756_s11 = inlined_call_operand.vmem [shape: f32[32,32], index: 11, kind: input, shape index: {}]   ;;  %s1757_s12 = inlined_call_operand.vmem [shape: f32[1,32], index: 12, kind: input, shape index: {}]   ;;  %s1758_s13 = inlined_call_operand.vmem [shape: f32[2,32], index: 13, kind: input, shape index: {}]   ;;  %s1759_s14 = inlined_call_operand.vmem [shape: f32[2,32], index: 14, kind: input, shape index: {}]   ;;  %s1760_s15 = inlined_call_operand.vmem [shape: f32[32,64], index: 15, kind: input, shape index: {}]   ;;  %s1761_s16 = inlined_call_operand.vmem [shape: f32[1,64], index: 16, kind: input, shape index: {}]   ;;  %s1762_s17 = inlined_call_operand.vmem [shape: f32[64,32], index: 17, kind: input, shape index: {}]   ;;  %s1763_s18 = inlined_call_operand.vmem [shape: f32[1,32], index: 18, kind: input, shape index: {}]   ;;  %s1764_s19 = inlined_call_operand.vmem [shape: f32[8,32], index: 19, kind: input, shape index: {}]   ;;  %s1765_s20 = inlined_call_operand.vmem [shape: f32[2,8], index: 20, kind: input, shape index: {}]   ;;  %s1766_s21 = inlined_call_operand.hbm [shape: f32[2,32], index: 21, kind: output, shape index: {}]  }
   0x1   :  { %1771 = sst [smem:[#allocation6_spill]] %s1745_s0 }
   0x2   :  { %1772 = sst [smem:[#allocation7_spill]] %s1746_s1 }
   0x3   :  { %1773 = sst [smem:[#allocation8_spill]] %s1747_s2 }
   0x4   :  { %1774 = sst [smem:[#allocation9_spill]] %s1748_s3 }
   0x5   :  { %1775 = sst [smem:[#allocation10_spill]] %s1749_s4 }
   0x6   :  { %1776 = sst [smem:[#allocation11_spill]] %s1750_s5 }
   0x7   :  { %s1777_s26 = sld [smem:[#allocation6_spill]]  ;;  %vm561_vm0 = vcmask 254976  }
   0x8   :  { %s1778_s28 = sld [smem:[#allocation11_spill]] }
   0x9   :  { %s1779_s5 = sld [smem:[#allocation9_spill]] }
   0xd   :  { %v1160_v0 = vld [vmem:[%s1777_s26] sm:$0x3] }
   0xe   :  { %v239_v1 = vld [vmem:[%s1778_s28] sm:$0xff]  ;;  %v562_v3 = vsel %vm561_vm0, %v1160_v0, 0.0  ;;  %v240_v6 = vld [vmem:[%s1778_s28 + $0x8] sm:$0xff]  ;;  %v241_v31 = vld [vmem:[%s1778_s28 + $0x10] sm:$0xff] }
   0xf   :  { %v255_v2 = vld [vmem:[%s1778_s28 + $0x80] sm:$0xff]  ;;  %v126_v5 = vld [vmem:[%s1779_s5 + $0x178] sm:$0xff]  ;;  %563 = vadd.xlane.f32.xlu0 %v562_v3  ;;  %v256_v7 = vld [vmem:[%s1778_s28 + $0x88] sm:$0xff] }
  0x10   :  { %v923_v4 = vpack.i.bf16 %v255_v2, %v239_v1  ;;  %193 = vmatpush.msra.mxu2 %v126_v5  ;;  %v94_v8 = vld [vmem:[%s1779_s5 + $0x78] sm:$0xff]  ;;  %v125_v9 = vld [vmem:[%s1779_s5 + $0x170] sm:$0xff]  ;;  %v124_v13 = vld [vmem:[%s1779_s5 + $0x168] sm:$0xff]  ;;  %v925_v21 = vpack.i.bf16 %v256_v7, %v240_v6 }
  0x11   :  { %v142_v10 = vld [vmem:[%s1779_s5 + $0x1f8] sm:$0xff]  ;;  %147 = vmatpush.msra.mxu0 %v94_v8  ;;  %v93_v11 = vld [vmem:[%s1779_s5 + $0x70] sm:$0xff]  ;;  %v92_v15 = vld [vmem:[%s1779_s5 + $0x68] sm:$0xff] }
  0x12   :  { %924 = vxpose.xlu1.b32.start [1/16] (narrow) %v923_v4, 8  ;;  %v110_v12 = vld [vmem:[%s1779_s5 + $0xf8] sm:$0xff]  ;;  %194 = vmatpush.msra.mxu2 %v125_v9  ;;  %v141_v14 = vld [vmem:[%s1779_s5 + $0x1f0] sm:$0xff]  ;;  %v123_v17 = vld [vmem:[%s1779_s5 + $0x160] sm:$0xff] }
  0x13   :  { %216 = vmatpush.msra.mxu3 %v142_v10  ;;  %v109_v16 = vld [vmem:[%s1779_s5 + $0xf0] sm:$0xff]  ;;  %148 = vmatpush.msra.mxu0 %v93_v11  ;;  %v140_v18 = vld [vmem:[%s1779_s5 + $0x1e8] sm:$0xff]  ;;  %v91_v19 = vld [vmem:[%s1779_s5 + $0x60] sm:$0xff] }
  0x14   :  { %170 = vmatpush.msra.mxu1 %v110_v12  ;;  %195 = vmatpush.msra.mxu2 %v124_v13  ;;  %v108_v20 = vld [vmem:[%s1779_s5 + $0xe8] sm:$0xff]  ;;  %v122_v22 = vld [vmem:[%s1779_s5 + $0x158] sm:$0xff]  ;;  %v139_v23 = vld [vmem:[%s1779_s5 + $0x1e0] sm:$0xff] }
  0x15   :  { %217 = vmatpush.msra.mxu3 %v141_v14  ;;  %149 = vmatpush.msra.mxu0 %v92_v15  ;;  %v90_v24 = vld [vmem:[%s1779_s5 + $0x58] sm:$0xff]  ;;  %v107_v25 = vld [vmem:[%s1779_s5 + $0xe0] sm:$0xff]  ;;  %v121_v26 = vld [vmem:[%s1779_s5 + $0x150] sm:$0xff] }
  0x16   :  { %171 = vmatpush.msra.mxu1 %v109_v16  ;;  %196 = vmatpush.msra.mxu2 %v123_v17  ;;  %v271_v27 = vld [vmem:[%s1778_s28 + $0x100] sm:$0xff]  ;;  %v138_v29 = vld [vmem:[%s1779_s5 + $0x1d8] sm:$0xff]  ;;  %v89_v32 = vld [vmem:[%s1779_s5 + $0x50] sm:$0xff] }
  0x17   :  { %218 = vmatpush.msra.mxu3 %v140_v18  ;;  %150 = vmatpush.msra.mxu0 %v91_v19  ;;  %v287_v28 = vld [vmem:[%s1778_s28 + $0x180] sm:$0xff]  ;;  %v106_v33 = vld [vmem:[%s1779_s5 + $0xd8] sm:$0xff]  ;;  %v257_v34 = vld [vmem:[%s1778_s28 + $0x90] sm:$0xff] }
  0x18   :  { %172 = vmatpush.msra.mxu1 %v108_v20  ;;  %197 = vmatpush.msra.mxu2 %v122_v22  ;;  %v960_v30 = vpack.i.bf16 %v287_v28, %v271_v27  ;;  %v120_v35 = vld [vmem:[%s1779_s5 + $0x148] sm:$0xff]  ;;  %v137_v36 = vld [vmem:[%s1779_s5 + $0x1d0] sm:$0xff]  ;;  %v119_v39 = vld [vmem:[%s1779_s5 + $0x140] sm:$0xff]  ;;  %v927_v41 = vpack.i.bf16 %v257_v34, %v241_v31 }
  0x19   :  { %219 = vmatpush.msra.mxu3 %v139_v23  ;;  %151 = vmatpush.msra.mxu0 %v90_v24  ;;  %v88_v37 = vld [vmem:[%s1779_s5 + $0x48] sm:$0xff]  ;;  %v105_v38 = vld [vmem:[%s1779_s5 + $0xd0] sm:$0xff]  ;;  %v87_v42 = vld [vmem:[%s1779_s5 + $0x40] sm:$0xff] }
  0x1a   :  { %926 = vxpose.xlu1.b32.cont [2/16] (narrow) %v925_v21, 8  ;;  %173 = vmatpush.msra.mxu1 %v107_v25  ;;  %v136_v40 = vld [vmem:[%s1779_s5 + $0x1c8] sm:$0xff]  ;;  %v118_v45 = vld [vmem:[%s1779_s5 + $0x138] sm:$0xff]  ;;  %v135_v47 = vld [vmem:[%s1779_s5 + $0x1c0] sm:$0xff] }
  0x1b   :  { %198 = vmatpush.msra.mxu2 %v121_v26  ;;  %220 = vmatpush.msra.mxu3 %v138_v29  ;;  %v104_v43 = vld [vmem:[%s1779_s5 + $0xc8] sm:$0xff]  ;;  %v86_v48 = vld [vmem:[%s1779_s5 + $0x38] sm:$0xff]  ;;  %v103_v49 = vld [vmem:[%s1779_s5 + $0xc0] sm:$0xff] }
  0x1c   :  { %961 = vxpose.xlu2.b32.start [1/16] (narrow) %v960_v30, 8  ;;  %152 = vmatpush.msra.mxu0 %v89_v32  ;;  %v272_v44 = vld [vmem:[%s1778_s28 + $0x108] sm:$0xff]  ;;  %v117_v50 = vld [vmem:[%s1779_s5 + $0x130] sm:$0xff]  ;;  %v242_v52 = vld [vmem:[%s1778_s28 + $0x18] sm:$0xff] }
  0x1d   :  { %174 = vmatpush.msra.mxu1 %v106_v33  ;;  %199 = vmatpush.msra.mxu2 %v120_v35  ;;  %v288_v46 = vld [vmem:[%s1778_s28 + $0x188] sm:$0xff]  ;;  %v134_v53 = vld [vmem:[%s1779_s5 + $0x1b8] sm:$0xff]  ;;  %v85_v55 = vld [vmem:[%s1779_s5 + $0x30] sm:$0xff] }
  0x1e   :  { %221 = vmatpush.msra.mxu3 %v137_v36  ;;  %153 = vmatpush.msra.mxu0 %v88_v37  ;;  %v962_v51 = vpack.i.bf16 %v288_v46, %v272_v44  ;;  %v258_v54 = vld [vmem:[%s1778_s28 + $0x98] sm:$0xff]  ;;  %v116_v57 = vld [vmem:[%s1779_s5 + $0x128] sm:$0xff]  ;;  %v133_v58 = vld [vmem:[%s1779_s5 + $0x1b0] sm:$0xff] }
  0x1f   :  { %175 = vmatpush.msra.mxu1 %v105_v38  ;;  %200 = vmatpush.msra.mxu2 %v119_v39  ;;  %v102_v56 = vld [vmem:[%s1779_s5 + $0xb8] sm:$0xff]  ;;  %v84_v59 = vld [vmem:[%s1779_s5 + $0x28] sm:$0xff]  ;;  %v101_v60 = vld [vmem:[%s1779_s5 + $0xb0] sm:$0xff]  ;;  %v929_v61 = vpack.i.bf16 %v258_v54, %v242_v52 }
  0x20   :  { %222 = vmatpush.msra.mxu3 %v136_v40  ;;  %154 = vmatpush.msra.mxu0 %v87_v42  ;;  %v115_v62 = vld [vmem:[%s1779_s5 + $0x120] sm:$0xff]  ;;  %v132_v63 = vld [vmem:[%s1779_s5 + $0x1a8] sm:$0xff]  ;;  %v273_v2 = vld [vmem:[%s1778_s28 + $0x110] sm:$0xff] }
  0x21   :  { %176 = vmatpush.msra.mxu1 %v104_v43  ;;  %201 = vmatpush.msra.mxu2 %v118_v45  ;;  %v83_v1 = vld [vmem:[%s1779_s5 + $0x20] sm:$0xff]  ;;  %v289_v3 = vld [vmem:[%s1778_s28 + $0x190] sm:$0xff]  ;;  %v100_v4 = vld [vmem:[%s1779_s5 + $0xa8] sm:$0xff] }
  0x22   :  { %928 = vxpose.xlu1.b32.cont [3/16] (narrow) %v927_v41, 8  ;;  %223 = vmatpush.msra.mxu3 %v135_v47  ;;  %v114_v5 = vld [vmem:[%s1779_s5 + $0x118] sm:$0xff]  ;;  %v243_v6 = vld [vmem:[%s1778_s28 + $0x20] sm:$0xff]  ;;  %v113_v11 = vld [vmem:[%s1779_s5 + $0x110] sm:$0xff]  ;;  %v964_v13 = vpack.i.bf16 %v289_v3, %v273_v2 }
  0x23   :  { %155 = vmatpush.msra.mxu0 %v86_v48  ;;  %177 = vmatpush.msra.mxu1 %v103_v49  ;;  %v259_v7 = vld [vmem:[%s1778_s28 + $0xa0] sm:$0xff]  ;;  %v82_v9 = vld [vmem:[%s1779_s5 + $0x18] sm:$0xff]  ;;  %v81_v14 = vld [vmem:[%s1779_s5 + $0x10] sm:$0xff] }
  0x24   :  { %202 = vmatpush.msra.mxu2 %v117_v50  ;;  %224 = vmatpush.msra.mxu3 %v134_v53  ;;  %v131_v8 = vld [vmem:[%s1779_s5 + $0x1a0] sm:$0xff]  ;;  %v130_v12 = vld [vmem:[%s1779_s5 + $0x198] sm:$0xff]  ;;  %v112_v16 = vld [vmem:[%s1779_s5 + $0x108] sm:$0xff]  ;;  %v931_v19 = vpack.i.bf16 %v259_v7, %v243_v6 }
  0x25   :  { %963 = vxpose.xlu2.b32.cont [2/16] (narrow) %v962_v51, 8  ;;  %156 = vmatpush.msra.mxu0 %v85_v55  ;;  %v99_v10 = vld [vmem:[%s1779_s5 + $0xa0] sm:$0xff]  ;;  %v98_v15 = vld [vmem:[%s1779_s5 + $0x98] sm:$0xff]  ;;  %v129_v17 = vld [vmem:[%s1779_s5 + $0x190] sm:$0xff] }
  0x26   :  { %178 = vmatpush.msra.mxu1 %v102_v56  ;;  %203 = vmatpush.msra.mxu2 %v116_v57  ;;  %v80_v18 = vld [vmem:[%s1779_s5 + $0x8] sm:$0xff]  ;;  %v97_v20 = vld [vmem:[%s1779_s5 + $0x90] sm:$0xff]  ;;  %v111_v21 = vld [vmem:[%s1779_s5 + $0x100] sm:$0xff] }
  0x27   :  { %225 = vmatpush.msra.mxu3 %v133_v58  ;;  %157 = vmatpush.msra.mxu0 %v84_v59  ;;  %v128_v22 = vld [vmem:[%s1779_s5 + $0x188] sm:$0xff] }
  0x28   :  { %179 = vmatpush.msra.mxu1 %v101_v60  ;;  %204 = vmatpush.msra.mxu2 %v115_v62 }
  0x29   :  { %226 = vmatpush.msra.mxu3 %v132_v63  ;;  %158 = vmatpush.msra.mxu0 %v83_v1 }
  0x2a   :  { %930 = vxpose.xlu1.b32.cont [4/16] (narrow) %v929_v61, 8  ;;  %180 = vmatpush.msra.mxu1 %v100_v4 }
  0x2b   :  { %205 = vmatpush.msra.mxu2 %v114_v5  ;;  %227 = vmatpush.msra.mxu3 %v131_v8 }
  0x2c   :  { %159 = vmatpush.msra.mxu0 %v82_v9  ;;  %181 = vmatpush.msra.mxu1 %v99_v10 }
  0x2d   :  { %206 = vmatpush.msra.mxu2 %v113_v11  ;;  %228 = vmatpush.msra.mxu3 %v130_v12 }
  0x2e   :  { %965 = vxpose.xlu2.b32.cont [3/16] (narrow) %v964_v13, 8  ;;  %160 = vmatpush.msra.mxu0 %v81_v14 }
  0x2f   :  { %182 = vmatpush.msra.mxu1 %v98_v15 }
  0x30   :  { %27 = vsyncpa [#allocation4], 0  ;;  %207 = vmatpush.msra.mxu2 %v112_v16  ;;  %229 = vmatpush.msra.mxu3 %v129_v17  ;;  %s1780_s25 = sld [smem:[#allocation7_spill]]  ;;  %v274_v24 = vld [vmem:[%s1778_s28 + $0x118] sm:$0xff]  ;;  %v79_v26 = vld [vmem:[%s1779_s5] sm:$0xff]  ;;  %v1044_v46 = vmov 32.0  }
  0x31   :  { %v290_v25 = vld [vmem:[%s1778_s28 + $0x198] sm:$0xff]  ;;  %161 = vmatpush.msra.mxu0 %v80_v18  ;;  %183 = vmatpush.msra.mxu1 %v97_v20  ;;  %v96_v27 = vld [vmem:[%s1779_s5 + $0x88] sm:$0xff]  ;;  %v127_v29 = vld [vmem:[%s1779_s5 + $0x180] sm:$0xff]  ;;  %1008 = vrcp.f32 %v1044_v46  ;;  %s1782_s0 = sld [smem:[#allocation10_spill]]  ;;  %vm529_vm2 = vcmask 261120   ;;  %vm634_vm6 = vcmask 1041408  }
  0x32   :  { %932 = vxpose.xlu1.b32.cont [5/16] (narrow) %v931_v19, 8  ;;  %208 = vmatpush.msra.mxu2 %v111_v21  ;;  %v244_v28 = vld [vmem:[%s1778_s28 + $0x28] sm:$0xff]  ;;  %v95_v33 = vld [vmem:[%s1779_s5 + $0x80] sm:$0xff]  ;;  %v966_v34 = vpack.i.bf16 %v290_v25, %v274_v24  ;;  %v245_v37 = vld [vmem:[%s1778_s28 + $0x30] sm:$0xff]  ;;  %vm636_vm7 = vcmask 1043456   ;;  %vm638_vm8 = vcmask 1045504  }
  0x33   :  { %230 = vmatpush.msra.mxu3 %v128_v22  ;;  %v260_v31 = vld [vmem:[%s1778_s28 + $0xa8] sm:$0xff]  ;;  %162 = vmatpush.msra.mxu0 %v79_v26  ;;  %v261_v38 = vld [vmem:[%s1778_s28 + $0xb0] sm:$0xff]  ;;  %v275_v43 = vld [vmem:[%s1778_s28 + $0x120] sm:$0xff]  ;;  %vm673_vm9 = vcmask 130048   ;;  %vm729_vm14 = vcmask 64512  }
  0x34   :  { %184 = vmatpush.msra.mxu1 %v96_v27  ;;  %v933_v36 = vpack.i.bf16 %v260_v31, %v244_v28  ;;  %v935_v40 = vpack.i.bf16 %v261_v38, %v245_v37  ;;  %v291_v44 = vld [vmem:[%s1778_s28 + $0x1a0] sm:$0xff]  ;;  %v246_v48 = vld [vmem:[%s1778_s28 + $0x38] sm:$0xff]  ;;  %v276_v50 = vld [vmem:[%s1778_s28 + $0x128] sm:$0xff] }
  0x35   :  { %231 = vmatpush.msra.mxu3 %v127_v29  ;;  %v968_v47 = vpack.i.bf16 %v291_v44, %v275_v43  ;;  %v262_v49 = vld [vmem:[%s1778_s28 + $0xb8] sm:$0xff]  ;;  %v292_v52 = vld [vmem:[%s1778_s28 + $0x1a8] sm:$0xff]  ;;  %v247_v56 = vld [vmem:[%s1778_s28 + $0x40] sm:$0xff] }
  0x36   :  { %v73_v23 = vld [vmem:[%s1780_s25 + $0x10] sm:$0xff]  ;;  %v71_v30 = vld [vmem:[%s1780_s25] sm:$0xff]  ;;  %v74_v32 = vld [vmem:[%s1780_s25 + $0x18] sm:$0xff]  ;;  %185 = vmatpush.msra.mxu1 %v95_v33  ;;  %967 = vxpose.xlu2.b32.cont [4/16] (narrow) %v966_v34, 8  ;;  %v937_v51 = vpack.i.bf16 %v262_v49, %v246_v48  ;;  %v970_v54 = vpack.i.bf16 %v292_v52, %v276_v50 }
  0x37   :  { %209 = vmatmul.f32.vlgmr.msra.gmra.mxu2 %v73_v23  ;;  %v72_v35 = vld [vmem:[%s1780_s25 + $0x8] sm:$0xff]  ;;  %163 = vmatmul.f32.vlgmr.msra.gmra.mxu0 %v71_v30  ;;  %v77_v39 = vld [vmem:[%s1780_s25 + $0x30] sm:$0xff]  ;;  %v75_v41 = vld [vmem:[%s1780_s25 + $0x20] sm:$0xff]  ;;  %v1009_v53 = vpop.eup %1008 }
  0x38   :  { %232 = vmatmul.f32.vlgmr.msra.gmra.mxu3 %v74_v32  ;;  %186 = vmatmul.f32.vlgmr.msra.gmra.mxu1 %v72_v35  ;;  %v78_v42 = vld [vmem:[%s1780_s25 + $0x38] sm:$0xff]  ;;  %v76_v45 = vld [vmem:[%s1780_s25 + $0x28] sm:$0xff]  ;;  %v566_v55 = vmul.f32 32.0, %v1009_v53  ;;  %v263_v57 = vld [vmem:[%s1778_s28 + $0xc0] sm:$0xff]  ;;  %vm570_vm1 = vweird.f32 %v1009_v53  ;;  %s1781_s25 = sld [smem:[#allocation8_spill]] }
  0x39   :  { %v277_v58 = vld [vmem:[%s1778_s28 + $0x130] sm:$0xff]  ;;  %v939_v60 = vpack.i.bf16 %v263_v57, %v247_v56  ;;  %v248_v1 = vld [vmem:[%s1778_s28 + $0x48] sm:$0xff]  ;;  %v278_v3 = vld [vmem:[%s1778_s28 + $0x138] sm:$0xff] }
  0x3a   :  { %934 = vxpose.xlu1.b32.cont [6/16] (narrow) %v933_v36, 8  ;;  %v293_v59 = vld [vmem:[%s1778_s28 + $0x1b0] sm:$0xff]  ;;  %v567_v61 = vsub.f32 1.0, %v566_v55  ;;  %v264_v2 = vld [vmem:[%s1778_s28 + $0xc8] sm:$0xff]  ;;  %v294_v4 = vld [vmem:[%s1778_s28 + $0x1b8] sm:$0xff] }
  0x3b   :  { %v972_v62 = vpack.i.bf16 %v293_v59, %v277_v58  ;;  %v941_v5 = vpack.i.bf16 %v264_v2, %v248_v1  ;;  %v974_v7 = vpack.i.bf16 %v294_v4, %v278_v3  ;;  %v249_v9 = vld [vmem:[%s1778_s28 + $0x50] sm:$0xff]  ;;  %v279_v12 = vld [vmem:[%s1778_s28 + $0x140] sm:$0xff]  ;;  %v250_v19 = vld [vmem:[%s1778_s28 + $0x58] sm:$0xff] }
  0x3c   :  { %v568_v63 = vmul.f32 %v1009_v53, %v567_v61  ;;  %v265_v10 = vld [vmem:[%s1778_s28 + $0xd0] sm:$0xff]  ;;  %v295_v13 = vld [vmem:[%s1778_s28 + $0x1c0] sm:$0xff]  ;;  %v266_v20 = vld [vmem:[%s1778_s28 + $0xd8] sm:$0xff] }
  0x3d   :  { %v943_v15 = vpack.i.bf16 %v265_v10, %v249_v9  ;;  %v976_v17 = vpack.i.bf16 %v295_v13, %v279_v12  ;;  %v280_v22 = vld [vmem:[%s1778_s28 + $0x148] sm:$0xff]  ;;  %v945_v24 = vpack.i.bf16 %v266_v20, %v250_v19  ;;  %v251_v26 = vld [vmem:[%s1778_s28 + $0x60] sm:$0xff]  ;;  %v281_v28 = vld [vmem:[%s1778_s28 + $0x150] sm:$0xff] }
  0x3e   :  { %969 = vxpose.xlu2.b32.cont [5/16] (narrow) %v968_v47, 8  ;;  %v569_v6 = vadd.f32 %v1009_v53, %v568_v63  ;;  %v296_v23 = vld [vmem:[%s1778_s28 + $0x1c8] sm:$0xff]  ;;  %v267_v27 = vld [vmem:[%s1778_s28 + $0xe0] sm:$0xff]  ;;  %v297_v29 = vld [vmem:[%s1778_s28 + $0x1d0] sm:$0xff] }
  0x3f   :  { %212 = vmatmul.f32.gmra.mxu2 %v77_v39  ;;  %166 = vmatmul.f32.gmra.mxu0 %v75_v41  ;;  %v978_v25 = vpack.i.bf16 %v296_v23, %v280_v22  ;;  %v947_v30 = vpack.i.bf16 %v267_v27, %v251_v26  ;;  %v980_v31 = vpack.i.bf16 %v297_v29, %v281_v28  ;;  %v252_v32 = vld [vmem:[%s1778_s28 + $0x68] sm:$0xff]  ;;  %v282_v34 = vld [vmem:[%s1778_s28 + $0x158] sm:$0xff]  ;;  %v253_v38 = vld [vmem:[%s1778_s28 + $0x70] sm:$0xff] }
  0x40   :  { %235 = vmatmul.f32.gmra.mxu3 %v78_v42  ;;  %189 = vmatmul.f32.gmra.mxu1 %v76_v45  ;;  %v1488_v8 = vsel %vm570_vm1, %v1009_v53, %v569_v6  ;;  %v268_v33 = vld [vmem:[%s1778_s28 + $0xe8] sm:$0xff]  ;;  %v298_v35 = vld [vmem:[%s1778_s28 + $0x1d8] sm:$0xff]  ;;  %v269_v39 = vld [vmem:[%s1778_s28 + $0xf0] sm:$0xff] }
  0x41   :  { %v949_v36 = vpack.i.bf16 %v268_v33, %v252_v32  ;;  %v982_v37 = vpack.i.bf16 %v298_v35, %v282_v34  ;;  %v283_v41 = vld [vmem:[%s1778_s28 + $0x160] sm:$0xff]  ;;  %v951_v43 = vpack.i.bf16 %v269_v39, %v253_v38  ;;  %v254_v45 = vld [vmem:[%s1778_s28 + $0x78] sm:$0xff]  ;;  %v284_v47 = vld [vmem:[%s1778_s28 + $0x168] sm:$0xff] }
  0x42   :  { %936 = vxpose.xlu1.b32.cont [7/16] (narrow) %v935_v40, 8  ;;  %v307_v40 = vld [vmem:[%s1781_s25 + $0x20] sm:$0xff]  ;;  %v270_v46 = vld [vmem:[%s1778_s28 + $0xf8] sm:$0xff]  ;;  %v300_v48 = vld [vmem:[%s1778_s28 + $0x1e8] sm:$0xff] }
  0x43   :  { %v299_v42 = vld [vmem:[%s1778_s28 + $0x1e0] sm:$0xff]  ;;  %455 = vmatpush.xpose.msrb.mxu0 %v307_v40  ;;  %v953_v49 = vpack.i.bf16 %v270_v46, %v254_v45  ;;  %v986_v50 = vpack.i.bf16 %v300_v48, %v284_v47  ;;  %v301_v52 = vld [vmem:[%s1778_s28 + $0x1f0] sm:$0xff]  ;;  %v302_v55 = vld [vmem:[%s1778_s28 + $0x1f8] sm:$0xff] }
  0x44   :  { %v984_v44 = vpack.i.bf16 %v299_v42, %v283_v41  ;;  %v303_v56 = vld [vmem:[%s1781_s25] sm:$0xff]  ;;  %v309_v63 = vld [vmem:[%s1781_s25 + $0x30] sm:$0xff]  ;;  %v524_v1 = vld [vmem:[%s1754_s9 + $0x18] sm:$0xff] }
  0x45   :  { %v1002_v58 = vld [vmem:[%s1782_s0] ss:$0 sm:$0xff]  ;;  %495 = vmatpush.xpose.msrb.mxu2 %v309_v63  ;;  %v310_v4 = vld [vmem:[%s1781_s25 + $0x38] sm:$0xff]  ;;  %v308_v9 = vld [vmem:[%s1781_s25 + $0x28] sm:$0xff] }
  0x46   :  { %971 = vxpose.xlu2.b32.cont [6/16] (narrow) %v970_v54, 8  ;;  %v286_v54 = vld [vmem:[%s1778_s28 + $0x178] sm:$0xff]  ;;  %515 = vmatpush.xpose.msrb.mxu3 %v310_v4  ;;  %v305_v10 = vld [vmem:[%s1781_s25 + $0x10] sm:$0xff]  ;;  %v304_v23 = vld [vmem:[%s1781_s25 + $0x8] sm:$0xff] }
  0x47   :  { %v990_v57 = vpack.i.bf16 %v302_v55, %v286_v54  ;;  %456 = vmatpush.xpose.msrb.mxu0 %v303_v56  ;;  %475 = vmatpush.xpose.msrb.mxu1 %v308_v9  ;;  %v596_v32 = vld [vmem:[%s1752_s7 + $0x8] sm:$0xff]  ;;  %v595_v33 = vld [vmem:[%s1752_s7] sm:$0xff] }
  0x48   :  { %v1638_v41 = vld [vmem:[%s1758_s13] sm:$0x3] }
  0x49   :  { %496 = vmatpush.xpose.msrb.mxu2 %v305_v10  ;;  %v591_v45 = vperm.slane %v1638_v41, 0 }
  0x4a   :  { %938 = vxpose.xlu1.b32.cont [8/16] (narrow) %v937_v51, 8  ;;  %v285_v51 = vld [vmem:[%s1778_s28 + $0x170] sm:$0xff] }
  0x4b   :  { %v988_v53 = vpack.i.bf16 %v301_v52, %v285_v51  ;;  %548 = vmatpush.msra.mxu0 %v524_v1  ;;  %476 = vmatpush.xpose.msrb.mxu1 %v304_v23  ;;  %v312_v52 = vstv %s1751_s6 }
  0x4e   :  { %973 = vxpose.xlu2.b32.cont [7/16] (narrow) %v972_v62, 8 }
  0x52   :  { %940 = vxpose.xlu1.b32.cont [9/16] (narrow) %v939_v60, 8 }
  0x56   :  { %975 = vxpose.xlu2.b32.cont [8/16] (narrow) %v974_v7, 8 }
  0x5a   :  { %942 = vxpose.xlu1.b32.cont [10/16] (narrow) %v941_v5, 8  ;;  %v523_v5 = vld [vmem:[%s1754_s9 + $0x10] sm:$0xff] }
  0x5b   :  { %549 = vmatpush.msra.mxu0 %v523_v5  ;;  %v626_v5 = vld [vmem:[%s1764_s19] sm:$0xff] }
  0x5e   :  { %977 = vxpose.xlu2.b32.cont [9/16] (narrow) %v976_v17, 8  ;;  %v306_v17 = vld [vmem:[%s1781_s25 + $0x18] sm:$0xff] }
  0x5f   :  { %516 = vmatpush.xpose.msrb.mxu3 %v306_v17 }
  0x62   :  { %944 = vxpose.xlu1.b32.cont [11/16] (narrow) %v943_v15, 8 }
  0x66   :  { %979 = vxpose.xlu2.b32.cont [10/16] (narrow) %v978_v25, 8 }
  0x6a   :  { %946 = vxpose.xlu1.b32.cont [12/16] (narrow) %v945_v24, 8 }
  0x6e   :  { %981 = vxpose.xlu2.b32.cont [11/16] (narrow) %v980_v31, 8  ;;  %v597_v31 = vld [vmem:[%s1752_s7 + $0x10] sm:$0xff] }
  0x72   :  { %948 = vxpose.xlu1.b32.cont [13/16] (narrow) %v947_v30, 8  ;;  %v598_v30 = vld [vmem:[%s1752_s7 + $0x18] sm:$0xff] }
  0x73   :  { %618 = vmatpush.msra.mxu1 %v598_v30 }
  0x75   :  { %619 = vmatpush.msra.mxu1 %v597_v31 }
  0x76   :  { %983 = vxpose.xlu2.b32.cont [12/16] (narrow) %v982_v37, 8 }
  0x77   :  { %620 = vmatpush.msra.mxu1 %v596_v32 }
  0x79   :  { %621 = vmatpush.msra.mxu1 %v595_v33 }
  0x7a   :  { %950 = vxpose.xlu1.b32.cont [14/16] (narrow) %v949_v36, 8 }
  0x7e   :  { %985 = vxpose.xlu2.b32.cont [13/16] (narrow) %v984_v44, 8  ;;  %v1643_v44 = vld [vmem:[%s1759_s14] sm:$0x3] }
  0x7f   :  { %v593_v48 = vperm.slane %v1643_v44, 0 }
  0x82   :  { %v564_v11 = vpop.xlane.xlu0 %563  ;;  %952 = vxpose.xlu1.b32.cont [15/16] (narrow) %v951_v43, 8 }
  0x83   :  { %v572_v14 = vmul.f32 %v1488_v8, %v564_v11  ;;  %v522_v11 = vld [vmem:[%s1754_s9 + $0x8] sm:$0xff] }
  0x84   :  { %550 = vmatpush.msra.mxu0 %v522_v11 }
  0x85   :  { %v1504_v16 = vsub.f32 %v1160_v0, %v572_v14 }
  0x86   :  { %987 = vxpose.xlu2.b32.cont [14/16] (narrow) %v986_v50, 8 }
  0x87   :  { %v574_v18 = vmul.f32 %v1504_v16, %v1504_v16 }
  0x89   :  { %v575_v21 = vsel %vm561_vm0, %v574_v18, 0.0  ;;  %v521_v18 = vld [vmem:[%s1754_s9] sm:$0xff] }
  0x8a   :  { %576 = vadd.xlane.f32.xlu0 %v575_v21  ;;  %954 = vxpose.xlu1.b32.end [16/16] (narrow) %v953_v49, 8 }
  0x8b   :  { %551 = vmatpush.msra.mxu0 %v521_v18 }
  0x8e   :  { %989 = vxpose.xlu2.b32.cont [15/16] (narrow) %v988_v53, 8 }
  0x96   :  { %991 = vxpose.xlu2.b32.end [16/16] (narrow) %v990_v57, 8  ;;  %v1003_v57 = vld [vmem:[%s1755_s10] ss:$0 sm:$0xff] }
  0xb4   :  { %v164_v59 = vpop.f32.mrf.mxu0 }
  0xb5   :  { %v165_v62 = vadd.f32 %v1002_v58, %v164_v59  ;;  %v187_v2 = vpop.f32.mrf.mxu1 }
  0xb6   :  { %v955_v60 = vpop.trf.xlu1 }
  0xb7   :  { %v956_v61 = vunpack.i.l.bf16 %v955_v60  ;;  %v188_v3 = vadd.f32 %v187_v2, %v165_v62  ;;  %v992_v12 = vpop.trf.xlu2  ;;  %v959_v20 = vunpack.i.h.bf16 %v955_v60 }
  0xb8   :  { %v993_v14 = vunpack.i.l.bf16 %v992_v12  ;;  %v996_v21 = vunpack.i.h.bf16 %v992_v12 }
  0xb9   :  { %457 = vmatmul.f32.vlgmr.msrb.gmra.mxu0 %v956_v61  ;;  %477 = vmatmul.f32.vlgmr.msrb.gmra.mxu1 %v959_v20  ;;  %v1004_v61 = vld [vmem:[%s1753_s8] ss:$0 sm:$0xff]  ;;  %s1045_s8 = smov 96  }
  0xba   :  { %v210_v6 = vpop.f32.mrf.mxu2  ;;  %497 = vmatmul.f32.vlgmr.msrb.gmra.mxu2 %v993_v14  ;;  %517 = vmatmul.f32.vlgmr.msrb.gmra.mxu3 %v996_v21 }
  0xbb   :  { %v211_v7 = vadd.f32 %v210_v6, %v188_v3  ;;  %v233_v13 = vpop.f32.mrf.mxu3 }
  0xbc   :  { %v167_v19 = vpop.f32.mrf.mxu0 }
  0xbd   :  { %v234_v15 = vadd.f32 %v233_v13, %v211_v7  ;;  %v168_v22 = vadd.f32 %v1002_v58, %v167_v19  ;;  %v190_v24 = vpop.f32.mrf.mxu1 }
  0xbf   :  { %v191_v25 = vadd.f32 %v190_v24, %v168_v22 }
  0xc1   :  { %897 = vmatmul.msk.f32.vlgmr.msra.gmra.mxu0 %vm529_vm2, %v234_v15 }
  0xc2   :  { %v213_v26 = vpop.f32.mrf.mxu2 }
  0xc3   :  { %v214_v27 = vadd.f32 %v213_v26, %v191_v25  ;;  %v236_v28 = vpop.f32.mrf.mxu3 }
  0xc5   :  { %v237_v29 = vadd.f32 %v236_v28, %v214_v27 }
  0xc9   :  { %898 = vmatmul.msk.f32.gmra.mxu0 %vm529_vm2, %v237_v29 }
  0xfd   :  { %v577_v34 = vpop.xlane.xlu0 %576 }
  0xfe   :  { %v578_v35 = vmul.f32 %v577_v34, %v1488_v8 }
 0x100   :  { %v579_v36 = vadd.f32 1e-06, %v578_v35 }
 0x102   :  { %1010 = vrsqrt.f32 %v579_v36  ;;  %vm586_vm4 = vweird.f32 %v579_v36 }
 0x108   :  { %v1011_v37 = vpop.eup %1010 }
 0x109   :  { %v581_v38 = vmul.f32 %v1011_v37, %v579_v36  ;;  %vm587_vm3 = vweird.f32 %v1011_v37 }
 0x10a   :  { %vm588_vm5 = vmor %vm586_vm4, %vm587_vm3 }
 0x10b   :  { %v582_v39 = vmul.f32 %v1011_v37, %v581_v38 }
 0x10d   :  { %v583_v40 = vmul.f32 0.5, %v582_v39 }
 0x10f   :  { %v584_v42 = vsub.f32 1.5, %v583_v40  ;;  %v756_v40 = vld [vmem:[%s1756_s11 + $0x18] sm:$0xff] }
 0x111   :  { %v585_v43 = vmul.f32 %v1011_v37, %v584_v42  ;;  %v755_v42 = vld [vmem:[%s1756_s11 + $0x10] sm:$0xff] }
 0x113   :  { %v589_v46 = vsel %vm588_vm5, %v1011_v37, %v585_v43  ;;  %v754_v43 = vld [vmem:[%s1756_s11 + $0x8] sm:$0xff] }
 0x114   :  { %v590_v47 = vmul.f32 %v589_v46, %v1504_v16 }
 0x116   :  { %v592_v49 = vmul.f32 %v591_v45, %v590_v47  ;;  %v728_v47 = vld [vmem:[%s1765_s20] sm:$0x3] }
 0x118   :  { %v594_v50 = vadd.f32 %v593_v48, %v592_v49  ;;  %v753_v48 = vld [vmem:[%s1756_s11] sm:$0xff] }
 0x11a   :  { %899 = vmatmul.msk.f32.vlgmr.msra.gmra.mxu1 %vm529_vm2, %v594_v50  ;;  %v1005_v50 = vld [vmem:[%s1757_s12] ss:$0 sm:$0xff]  ;;  %s1046_s12 = smov [#allocation3]  }
 0x11b   :  { %s886_s20 = sshll.u32 %s1046_s12, 4  ;;  %s887_s20 = int_to_ptr.vmem [resolvable:$true] %s886_s20 }
 0x136   :  { %v458_v51 = vpop.f32.mrf.mxu0  ;;  %v478_v55 = vpop.f32.mrf.mxu1 }
 0x137   :  { %v459_v53 = vadd.f32 %v458_v51, %v312_v52 }
 0x139   :  { %v479_v56 = vadd.f32 %v478_v55, %v459_v53 }
 0x13d   :  { %v498_v10 = vpop.f32.mrf.mxu2  ;;  %v518_v12 = vpop.f32.mrf.mxu3 }
 0x13e   :  { %v553_v54 = vpop.f32.mrf.mxu0  ;;  %v499_v11 = vadd.f32 %v498_v10, %v479_v56 }
 0x13f   :  { %v554_v16 = vadd.f32 %v1003_v57, %v553_v54 }
 0x140   :  { %v519_v13 = vadd.f32 %v518_v12, %v499_v11 }
 0x142   :  { %v671_v15 = vperm.slane %v519_v13, 0  ;;  %v807_v13 = vperm.slane %v1638_v41, 1  ;;  %v843_v41 = vld [vmem:[%s1762_s17] sm:$0xff] }
 0x146   :  { %v556_v58 = vpop.f32.mrf.mxu0 }
 0x147   :  { %v557_v59 = vadd.f32 %v1003_v57, %v556_v58 }
 0x149   :  { %v997_v60 = vpack.i.bf16 %v554_v16, %v557_v59  ;;  %900 = vmatpush.xpose.msk.msra.mxu2 %vm529_vm2, %v557_v59  ;;  %v814_v59 = vld [vmem:[%s1760_s15 + $0x18] sm:$0xff] }
 0x14d   :  { %901 = vmatpush.xpose.msk.msra.mxu2 %vm529_vm2, %v554_v16 }
 0x151   :  { %776 = vmatpush.msrb.mxu2 %v756_v40 }
 0x153   :  { %777 = vmatpush.msrb.mxu2 %v755_v42 }
 0x155   :  { %778 = vmatpush.msrb.mxu2 %v754_v43 }
 0x157   :  { %779 = vmatpush.msrb.mxu2 %v753_v48 }
 0x197   :  { %v623_v62 = vpop.f32.mrf.mxu1 }
 0x198   :  { %v624_v63 = vadd.f32 %v1004_v61, %v623_v62  ;;  %v811_v61 = vld [vmem:[%s1760_s15] sm:$0xff]  ;;  %v850_v62 = vld [vmem:[%s1762_s17 + $0x38] sm:$0xff] }
 0x199   :  { %867 = vmatpush.msrb.mxu0 %v850_v62 }
 0x19a   :  { %v628_v1 = vrot.slane %v624_v63, 6  ;;  %v630_v2 = vrot.slane %v624_v63, 4  ;;  %v632_v3 = vrot.slane %v624_v63, 2 }
 0x19c   :  { %v635_v4 = vsel %vm634_vm6, %v624_v63, %v628_v1  ;;  %v849_v63 = vld [vmem:[%s1762_s17 + $0x30] sm:$0xff]  ;;  %v848_v1 = vld [vmem:[%s1762_s17 + $0x28] sm:$0xff] }
 0x19d   :  { %v637_v6 = vsel %vm636_vm7, %v635_v4, %v630_v2  ;;  %868 = vmatpush.msrb.mxu0 %v849_v63  ;;  %v847_v4 = vld [vmem:[%s1762_s17 + $0x20] sm:$0xff] }
 0x19e   :  { %v639_v7 = vsel %vm638_vm8, %v637_v6, %v632_v3  ;;  %v846_v6 = vld [vmem:[%s1762_s17 + $0x18] sm:$0xff] }
 0x19f   :  { %v640_v9 = vmul.f32 %v639_v7, %v626_v5  ;;  %869 = vmatpush.msrb.mxu0 %v848_v1 }
 0x1a1   :  { %902 = vmatmul.msk.f32.vlgmr.msra.gmra.mxu2 %vm529_vm2, %v640_v9  ;;  %870 = vmatpush.msrb.mxu0 %v847_v4 }
 0x1a3   :  { %871 = vmatpush.msrb.mxu0 %v846_v6 }
 0x224   :  { %v667_v14 = vpop.f32.mrf.mxu2 }
 0x225   :  { %v670_v17 = vmul.f32 0.35355338, %v667_v14 }
 0x227   :  { %v672_v18 = vadd.f32 %v671_v15, %v670_v17  ;;  %v809_v17 = vperm.slane %v1643_v44, 1  ;;  %v1006_v44 = vld [vmem:[%s1761_s16] ss:$0 sm:$0xff] }
 0x229   :  { %v674_v19 = vsel %vm673_vm9, %v672_v18, -inf }
 0x22a   :  { %675 = vmax.xlane.f32.xlu0 %v674_v19 }
 0x29d   :  { %v676_v20 = vpop.xlane.xlu0 %675 }
 0x29e   :  { %v677_v21 = vsub.f32 %v672_v18, %v676_v20  ;;  %v845_v20 = vld [vmem:[%s1762_s17 + $0x10] sm:$0xff] }
 0x29f   :  { %872 = vmatpush.msrb.mxu0 %v845_v20 }
 0x2a0   :  { %v678_v22 = vmul.f32 1.442695, %v677_v21  ;;  %v844_v21 = vld [vmem:[%s1762_s17 + $0x8] sm:$0xff]  ;;  %s888_s17 = sshll.u32 %s1766_s21, 4  ;;  %s889_s17 = int_to_ptr.hbm [resolvable:$true] %s888_s17 }
 0x2a1   :  { %873 = vmatpush.msrb.mxu0 %v844_v21 }
 0x2a2   :  { %1012 = vpow2.f32 %v678_v22 }
 0x2a3   :  { %874 = vmatpush.msrb.mxu0 %v843_v41 }
 0x2a8   :  { %v1013_v23 = vpop.eup %1012 }
 0x2a9   :  { %v680_v24 = vsel %vm673_vm9, %v1013_v23, 0.0 }
 0x2aa   :  { %681 = vadd.xlane.f32.xlu0 %v680_v24 }
 0x2be   :  { %998 = vrot.lane.b32.xlu0 %v997_v60, %s1045_s8  ;;  %v812_v60 = vld [vmem:[%s1760_s15 + $0x8] sm:$0xff] }
 0x31d   :  { %v682_v25 = vpop.xlane.xlu0 %681 }
 0x31e   :  { %1014 = vrcp.f32 %v682_v25  ;;  %v694_v31 = vand.u32 2147483648, %v682_v25  ;;  %vm688_vm11 = vweird.f32 %v682_v25  ;;  %v692_v32 = vand.u32 2147483647, %v682_v25 }
 0x320   :  { %v695_v34 = vor.u32 1.1754944e-38, %v694_v31  ;;  %vm693_vm13 = vcmp.eq.f32.partialorder %v692_v32, 8.507059e+37 }
 0x324   :  { %v1015_v26 = vpop.eup %1014 }
 0x325   :  { %v684_v27 = vmul.f32 %v1015_v26, %v682_v25  ;;  %vm689_vm10 = vweird.f32 %v1015_v26  ;;  %v1007_v25 = vld [vmem:[%s1763_s18] ss:$0 sm:$0xff] }
 0x326   :  { %vm690_vm12 = vmor %vm688_vm11, %vm689_vm10 }
 0x327   :  { %v685_v28 = vsub.f32 1.0, %v684_v27 }
 0x329   :  { %v686_v29 = vmul.f32 %v1015_v26, %v685_v28 }
 0x32b   :  { %v687_v30 = vadd.f32 %v1015_v26, %v686_v29 }
 0x32d   :  { %v691_v33 = vsel %vm690_vm12, %v1015_v26, %v687_v30 }
 0x32e   :  { %v696_v36 = vsel %vm693_vm13, %v695_v34, %v691_v33 }
 0x32f   :  { %v697_v39 = vmul.f32 %v1013_v23, %v696_v36 }
 0x330   :  { %v999_v35 = vpop.permute.xlu0 %998 }
 0x331   :  { %v1000_v37 = vunpack.i.l.bf16 %v999_v35  ;;  %v1001_v38 = vunpack.i.h.bf16 %v999_v35 }
 0x333   :  { %721 = vmatpush.msra.mxu3 %v1000_v37 }
 0x335   :  { %722 = vmatpush.msra.mxu3 %v1001_v38 }
 0x336   :  { %903 = vmatmul.msk.f32.vlgmr.msra.gmra.mxu3 %vm673_vm9, %v697_v39 }
 0x337   :  { %834 = vmatpush.msrb.mxu3 %v814_v59 }
 0x3b9   :  { %v724_v45 = vpop.f32.mrf.mxu3 }
 0x3ba   :  { %v727_v46 = vmul.f32 %v724_v45, %v626_v5 }
 0x3bc   :  { %748 = vmatpush.msrb.mxu1 %v727_v46 }
 0x3bd   :  { %904 = vmatmul.msk.f32.vlgmr.msrb.gmra.mxu1 %vm729_vm14, %v728_v47 }
 0x43a   :  { %v750_v49 = vpop.f32.mrf.mxu1 }
 0x43b   :  { %905 = vmatmul.msk.f32.vlgmr.msrb.gmra.mxu2 %vm529_vm2, %v750_v49 }
 0x4be   :  { %v781_v51 = vpop.f32.mrf.mxu2 }
 0x4bf   :  { %v782_v52 = vadd.f32 %v1005_v50, %v781_v51 }
 0x4c1   :  { %v1687_v53 = vadd.f32 %v782_v52, %v1160_v0  ;;  %v813_v0 = vld [vmem:[%s1760_s15 + $0x10] sm:$0xff] }
 0x4c2   :  { %835 = vmatpush.msrb.mxu3 %v813_v0 }
 0x4c3   :  { %v785_v54 = vsel %vm561_vm0, %v1687_v53, 0.0 }
 0x4c4   :  { %786 = vadd.xlane.f32.xlu0 %v785_v54  ;;  %836 = vmatpush.msrb.mxu3 %v812_v60 }
 0x4c6   :  { %837 = vmatpush.msrb.mxu3 %v811_v61 }
 0x537   :  { %v787_v55 = vpop.xlane.xlu0 %786 }
 0x538   :  { %v788_v56 = vmul.f32 %v787_v55, %v1488_v8 }
 0x53a   :  { %v789_v57 = vsub.f32 %v1687_v53, %v788_v56 }
 0x53c   :  { %v790_v16 = vmul.f32 %v789_v57, %v789_v57 }
 0x53e   :  { %v791_v58 = vsel %vm561_vm0, %v790_v16, 0.0 }
 0x53f   :  { %792 = vadd.xlane.f32.xlu0 %v791_v58 }
 0x5b2   :  { %v793_v2 = vpop.xlane.xlu0 %792 }
 0x5b3   :  { %v794_v3 = vmul.f32 %v793_v2, %v1488_v8 }
 0x5b5   :  { %v795_v5 = vadd.f32 1e-06, %v794_v3 }
 0x5b7   :  { %1016 = vrsqrt.f32 %v795_v5  ;;  %vm802_vm1 = vweird.f32 %v795_v5 }
 0x5bd   :  { %v1017_v7 = vpop.eup %1016 }
 0x5be   :  { %v797_v9 = vmul.f32 %v1017_v7, %v795_v5  ;;  %vm803_vm15 = vweird.f32 %v1017_v7 }
 0x5bf   :  { %vm804_vm3 = vmor %vm802_vm1, %vm803_vm15 }
 0x5c0   :  { %v798_v10 = vmul.f32 %v1017_v7, %v797_v9 }
 0x5c2   :  { %v799_v11 = vmul.f32 0.5, %v798_v10 }
 0x5c4   :  { %v800_v12 = vsub.f32 1.5, %v799_v11 }
 0x5c6   :  { %v801_v8 = vmul.f32 %v1017_v7, %v800_v12 }
 0x5c8   :  { %v805_v14 = vsel %vm804_vm3, %v1017_v7, %v801_v8 }
 0x5c9   :  { %v806_v15 = vmul.f32 %v805_v14, %v789_v57 }
 0x5cb   :  { %v808_v18 = vmul.f32 %v807_v13, %v806_v15 }
 0x5cd   :  { %v810_v19 = vadd.f32 %v809_v17, %v808_v18 }
 0x5cf   :  { %906 = vmatmul.msk.f32.vlgmr.msrb.gmra.mxu3 %vm529_vm2, %v810_v19  ;;  %vm855_vm2 = vcmask 523264  }
 0x652   :  { %v839_v22 = vpop.f32.mrf.mxu3 }
 0x653   :  { %v840_v23 = vadd.f32 %v1006_v44, %v839_v22 }
 0x655   :  { %v842_v24 = vmax.f32 %v840_v23, 0.0 }
 0x657   :  { %907 = vmatmul.msk.f32.vlgmr.msrb.gmra.mxu0 %vm855_vm2, %v842_v24 }
 0x6d4   :  { %v876_v26 = vpop.f32.mrf.mxu0 }
 0x6d5   :  { %v877_v27 = vadd.f32 %v1007_v25, %v876_v26 }
 0x6d7   :  { %v879_v28 = vadd.f32 %v877_v27, %v1687_v53 }
 0x6d9   :  { %880 = vst.msk [vmem:[#allocation3] sm:$0x3] %vm561_vm0, %v879_v28 }
 0x6da   :  { %891 = dma.vmem_to_hbm [thread:$0]  %s887_s20, 32, %s889_s17, [#allocation4]  }
 0x6db   :  { %1042 = dma.done.wait [#allocation4], 32  }
 0x6dc   :  { %1043 = vsyncadd [#allocation4], 4294967264 }
 0x6dd   :  { %896 = vsyncpa [#allocation4], 1 }

</bundles_post_ra>
